<compile_context>
chip_gen: v5e
topology: v5e:2x2
jax: 0.10.0
libtpu: 0.0.40
codegen_flags: <defaults>
</compile_context>

<pallas_src>
import functools

import jax
import jax.numpy as jnp
from jax.experimental import pallas as pl
from jax.experimental.pallas import tpu as pltpu


def _round_up(x, m):
    return ((x + m - 1) // m) * m


def fc_kernel(x_ref, w1_ref, b1_ref, w2_ref, b2_ref, enc_ref, dec_ref):
    # Fused: (x @ W1 + b1).relu() -> enc ; (enc @ W2 + b2).relu() -> dec
    x = x_ref[...]
    enc = jnp.dot(x, w1_ref[...], preferred_element_type=jnp.float32) + b1_ref[...]
    enc = jnp.maximum(enc, 0.0)
    enc_ref[...] = enc.astype(enc_ref.dtype)

    dec = jnp.dot(enc.astype(w2_ref.dtype), w2_ref[...],
                  preferred_element_type=jnp.float32) + b2_ref[...]
    dec = jnp.maximum(dec, 0.0)
    dec_ref[...] = dec.astype(dec_ref.dtype)


@functools.partial(jax.jit, static_argnames=("block_rows",))
def fc_forward(x, w1, b1, w2, b2, *, block_rows=512):
    """x: [B, 200] f32. w1: [200, H], b1: [H], w2: [H, 200], b2: [200].

    Returns (encoded [B, H], decoded [B, 200]).
    """
    B, D_in = x.shape
    H = w1.shape[1]
    D_out = w2.shape[1]

    # --- Lane-dense hidden dim: pad H up to a multiple of 128. ---------------
    H_pad = max(128, _round_up(H, 128))
    if H_pad != H:
        w1 = jnp.pad(w1, ((0, 0), (0, H_pad - H)))
        b1 = jnp.pad(b1, ((0, H_pad - H),))
        w2 = jnp.pad(w2, ((0, H_pad - H), (0, 0)))

    # --- Batch tiling: TB rows per grid step (multiple of 8 sublanes). -------
    TB = min(block_rows, _round_up(B, 8))
    B_pad = _round_up(B, TB)
    if B_pad != B:
        x = jnp.pad(x, ((0, B_pad - B), (0, 0)))

    grid = (B_pad // TB,)

    enc_shape = jax.ShapeDtypeStruct((B_pad, H_pad), x.dtype)
    dec_shape = jax.ShapeDtypeStruct((B_pad, D_out), x.dtype)

    flops = 2 * B_pad * H_pad * (D_in + D_out)
    bytes_accessed = x.dtype.itemsize * (
        B_pad * (D_in + H_pad + D_out)                      # x in, enc + dec out
        + D_in * H_pad + H_pad + H_pad * D_out + D_out)     # resident weights/biases

    enc_pad, dec_pad = pl.pallas_call(
        fc_kernel,
        out_shape=(enc_shape, dec_shape),
        grid=grid,
        in_specs=[
            pl.BlockSpec((TB, D_in), lambda i: (i, 0)),     # x streamed per batch tile
            pl.BlockSpec((D_in, H_pad), lambda i: (0, 0)),  # W1 resident (DMA once)
            pl.BlockSpec((1, H_pad), lambda i: (0, 0)),     # b1 resident
            pl.BlockSpec((H_pad, D_out), lambda i: (0, 0)),  # W2 resident
            pl.BlockSpec((1, D_out), lambda i: (0, 0)),     # b2 resident
        ],
        out_specs=(
            pl.BlockSpec((TB, H_pad), lambda i: (i, 0)),
            pl.BlockSpec((TB, D_out), lambda i: (i, 0)),
        ),
        compiler_params=pltpu.CompilerParams(
            dimension_semantics=("parallel",),              # shard batch across TCs (v7x)
        ),
        cost_estimate=pl.CostEstimate(
            flops=flops, transcendentals=0, bytes_accessed=bytes_accessed),
    )(x, w1, b1.reshape(1, H_pad), w2, b2.reshape(1, D_out))

    # Strip batch / hidden padding outside the kernel.
    return enc_pad[:B, :H], dec_pad[:B]


def init_params(key, hidden_1):
    """Deterministic PyTorch-style Linear init: U(-1/sqrt(fan_in), 1/sqrt(fan_in))."""
    k1, k2, k3, k4 = jax.random.split(key, 4)
    bound1 = 1.0 / jnp.sqrt(200.0)
    bound2 = 1.0 / jnp.sqrt(float(hidden_1))
    w1 = jax.random.uniform(k1, (200, hidden_1), jnp.float32, -bound1, bound1)
    b1 = jax.random.uniform(k2, (hidden_1,), jnp.float32, -bound1, bound1)
    w2 = jax.random.uniform(k3, (hidden_1, 200), jnp.float32, -bound2, bound2)
    b2 = jax.random.uniform(k4, (200,), jnp.float32, -bound2, bound2)
    return w1, b1, w2, b2


if __name__ == "__main__":
    key = jax.random.PRNGKey(0)
    k_x, k_p = jax.random.split(key)

    B = 8          # small batch (kernel tiles/pipelines automatically at large B)
    hidden_1 = 32  # latent dimension

    x = jax.random.normal(k_x, (B, 200), jnp.float32)
    w1, b1, w2, b2 = init_params(k_p, hidden_1)

    encoded, decoded = fc_forward(x, w1, b1, w2, b2)
    jax.block_until_ready((encoded, decoded))

    # Reference check in plain JAX (same math as the PyTorch module).
    enc_ref = jnp.maximum(x @ w1 + b1, 0.0)
    dec_ref = jnp.maximum(enc_ref @ w2 + b2, 0.0)
    assert encoded.shape == (B, hidden_1) and decoded.shape == (B, 200)
    assert jnp.allclose(encoded, enc_ref, atol=1e-5), "encoder mismatch"
    assert jnp.allclose(decoded, dec_ref, atol=1e-5), "decoder mismatch"

    print("KERNEL_OK")
</pallas_src>

<mosaic_0001>
module attributes {stable_mosaic.version = 11 : i64} {
  func.func @fc_kernel(%arg0: i32, %arg1: memref<8x200xf32, #tpu.memory_space<vmem>>, %arg2: memref<200x128xf32, #tpu.memory_space<vmem>>, %arg3: memref<1x128xf32, #tpu.memory_space<vmem>>, %arg4: memref<128x200xf32, #tpu.memory_space<vmem>>, %arg5: memref<1x200xf32, #tpu.memory_space<vmem>>, %arg6: memref<8x128xf32, #tpu.memory_space<vmem>>, %arg7: memref<8x200xf32, #tpu.memory_space<vmem>>) attributes {dimension_semantics = [#tpu.dimension_semantics<parallel>], iteration_bounds = array<i64: 1>, scalar_prefetch = 0 : i64, scratch_operands = 0 : i64, tpu.core_type = #tpu.core_type<tc>, window_params = [{transform_indices = @transform_0, window_bounds = array<i64: 8, 200>}, {pipeline_mode = #tpu.pipeline_mode<synchronous>, transform_indices = @transform_1, window_bounds = array<i64: 200, 128>}, {pipeline_mode = #tpu.pipeline_mode<synchronous>, transform_indices = @transform_2, window_bounds = array<i64: 1, 128>}, {pipeline_mode = #tpu.pipeline_mode<synchronous>, transform_indices = @transform_3, window_bounds = array<i64: 128, 200>}, {pipeline_mode = #tpu.pipeline_mode<synchronous>, transform_indices = @transform_4, window_bounds = array<i64: 1, 200>}, {transform_indices = @transform_5, window_bounds = array<i64: 8, 128>}, {transform_indices = @transform_6, window_bounds = array<i64: 8, 200>}]} {
    %c0 = arith.constant 0 : index
    %c0_0 = arith.constant 0 : index
    %0 = vector.load %arg1[%c0, %c0_0] : memref<8x200xf32, #tpu.memory_space<vmem>>, vector<8x200xf32>
    %c0_1 = arith.constant 0 : index
    %c0_2 = arith.constant 0 : index
    %1 = vector.load %arg2[%c0_1, %c0_2] : memref<200x128xf32, #tpu.memory_space<vmem>>, vector<200x128xf32>
    %cst = arith.constant dense<0.000000e+00> : vector<8x128xf32>
    %2 = tpu.matmul %0, %1, %cst {dimension_numbers = #tpu.dot_dimension_numbers<[1], [0], [0], [1], [0, 0, 1, 1], [], []>} : vector<8x200xf32>, vector<200x128xf32>, vector<8x128xf32> -> vector<8x128xf32>
    %c0_3 = arith.constant 0 : index
    %c0_4 = arith.constant 0 : index
    %3 = vector.load %arg3[%c0_3, %c0_4] : memref<1x128xf32, #tpu.memory_space<vmem>>, vector<1x128xf32>
    %4 = vector.broadcast %3 : vector<1x128xf32> to vector<8x128xf32>
    %5 = arith.addf %2, %4 : vector<8x128xf32>
    %cst_5 = arith.constant 0.000000e+00 : f32
    %6 = vector.broadcast %cst_5 : f32 to vector<8x128xf32>
    %7 = arith.maximumf %5, %6 : vector<8x128xf32>
    %c0_6 = arith.constant 0 : index
    %c0_7 = arith.constant 0 : index
    %8 = vector.load %arg6[%c0_6, %c0_7] : memref<8x128xf32, #tpu.memory_space<vmem>>, vector<8x128xf32>
    tpu.vector_store %arg6[%c0_6, %c0_7], %7 {strides = array<i32>} : memref<8x128xf32, #tpu.memory_space<vmem>>, vector<8x128xf32>,
    %c0_8 = arith.constant 0 : index
    %c0_9 = arith.constant 0 : index
    %9 = vector.load %arg4[%c0_8, %c0_9] : memref<128x200xf32, #tpu.memory_space<vmem>>, vector<128x200xf32>
    %cst_10 = arith.constant dense<0.000000e+00> : vector<8x200xf32>
    %10 = tpu.matmul %7, %9, %cst_10 {dimension_numbers = #tpu.dot_dimension_numbers<[1], [0], [0], [1], [0, 0, 1, 1], [], []>} : vector<8x128xf32>, vector<128x200xf32>, vector<8x200xf32> -> vector<8x200xf32>
    %c0_11 = arith.constant 0 : index
    %c0_12 = arith.constant 0 : index
    %11 = vector.load %arg5[%c0_11, %c0_12] : memref<1x200xf32, #tpu.memory_space<vmem>>, vector<1x200xf32>
    %12 = vector.broadcast %11 : vector<1x200xf32> to vector<8x200xf32>
    %13 = arith.addf %10, %12 : vector<8x200xf32>
    %cst_13 = arith.constant 0.000000e+00 : f32
    %14 = vector.broadcast %cst_13 : f32 to vector<8x200xf32>
    %15 = arith.maximumf %13, %14 : vector<8x200xf32>
    %c0_14 = arith.constant 0 : index
    %c0_15 = arith.constant 0 : index
    %16 = vector.load %arg7[%c0_14, %c0_15] : memref<8x200xf32, #tpu.memory_space<vmem>>, vector<8x200xf32>
    tpu.vector_store %arg7[%c0_14, %c0_15], %15 {strides = array<i32>} : memref<8x200xf32, #tpu.memory_space<vmem>>, vector<8x200xf32>,
    return
  }
  func.func @transform_0(%arg0: i32) -> (i32, i32) {
    %c0_i32 = arith.constant 0 : i32
    %c0_i32_0 = arith.constant 0 : i32
    return %arg0, %c0_i32 : i32, i32
  }
  func.func @transform_1(%arg0: i32) -> (i32, i32) {
    %c0_i32 = arith.constant 0 : i32
    %c0_i32_0 = arith.constant 0 : i32
    %c0_i32_1 = arith.constant 0 : i32
    return %c0_i32, %c0_i32_0 : i32, i32
  }
  func.func @transform_2(%arg0: i32) -> (i32, i32) {
    %c0_i32 = arith.constant 0 : i32
    %c0_i32_0 = arith.constant 0 : i32
    %c0_i32_1 = arith.constant 0 : i32
    return %c0_i32, %c0_i32_0 : i32, i32
  }
  func.func @transform_3(%arg0: i32) -> (i32, i32) {
    %c0_i32 = arith.constant 0 : i32
    %c0_i32_0 = arith.constant 0 : i32
    %c0_i32_1 = arith.constant 0 : i32
    return %c0_i32, %c0_i32_0 : i32, i32
  }
  func.func @transform_4(%arg0: i32) -> (i32, i32) {
    %c0_i32 = arith.constant 0 : i32
    %c0_i32_0 = arith.constant 0 : i32
    %c0_i32_1 = arith.constant 0 : i32
    return %c0_i32, %c0_i32_0 : i32, i32
  }
  func.func @transform_5(%arg0: i32) -> (i32, i32) {
    %c0_i32 = arith.constant 0 : i32
    %c0_i32_0 = arith.constant 0 : i32
    return %arg0, %c0_i32 : i32, i32
  }
  func.func @transform_6(%arg0: i32) -> (i32, i32) {
    %c0_i32 = arith.constant 0 : i32
    %c0_i32_0 = arith.constant 0 : i32
    return %arg0, %c0_i32 : i32, i32
  }
}

</mosaic_0001>

<bundles_post_ra>
// kernel: fc_forward.1
= control target key start
LH: loop header
LB: loop body
LE: loop exit
PB: predicated region body
PF: predicated region fallthrough
CT: control target
= control target key end

     0   :  { %12 = vsyncpa [#allocation3], 0  ;;  %s499_s0 = inlined_call_operand.vmem [shape: f32[8,200], index: 0, kind: input, shape index: {}]   ;;  %s500_s1 = inlined_call_operand.vmem [shape: f32[200,128], index: 1, kind: input, shape index: {}]   ;;  %s501_s2 = inlined_call_operand.vmem [shape: f32[1,128], index: 2, kind: input, shape index: {}]   ;;  %s502_s3 = inlined_call_operand.vmem [shape: f32[128,200], index: 3, kind: input, shape index: {}]   ;;  %s503_s4 = inlined_call_operand.vmem [shape: f32[1,200], index: 4, kind: input, shape index: {}]   ;;  %s504_s5 = inlined_call_operand.hbm [shape: f32[8,128], index: 5, kind: output, shape index: {0}]   ;;  %s505_s6 = inlined_call_operand.hbm [shape: f32[8,200], index: 6, kind: output, shape index: {1}]  }
   0x1   :  { %v41_v0 = vld [vmem:[%s500_s1 + $0x78] sm:$0xff]  ;;  %v40_v1 = vld [vmem:[%s500_s1 + $0x70] sm:$0xff]  ;;  %v39_v2 = vld [vmem:[%s500_s1 + $0x68] sm:$0xff] }
   0x2   :  { %59 = vmatpush.msra.mxu0 %v41_v0  ;;  %v50_v3 = vld [vmem:[%s500_s1 + $0xc0] sm:$0xff]  ;;  %v49_v4 = vld [vmem:[%s500_s1 + $0xb8] sm:$0xff]  ;;  %v48_v6 = vld [vmem:[%s500_s1 + $0xb0] sm:$0xff] }
   0x3   :  { %v38_v5 = vld [vmem:[%s500_s1 + $0x60] sm:$0xff]  ;;  %86 = vmatpush.msra.mxu1 %v50_v3  ;;  %v37_v7 = vld [vmem:[%s500_s1 + $0x58] sm:$0xff]  ;;  %v47_v8 = vld [vmem:[%s500_s1 + $0xa8] sm:$0xff] }
   0x4   :  { %60 = vmatpush.msra.mxu0 %v40_v1  ;;  %v36_v9 = vld [vmem:[%s500_s1 + $0x50] sm:$0xff]  ;;  %v46_v10 = vld [vmem:[%s500_s1 + $0xa0] sm:$0xff]  ;;  %v132_v12 = vld [vmem:[%s502_s3 + $0xf8] sm:$0xff] }
   0x5   :  { %87 = vmatpush.msra.mxu1 %v49_v4  ;;  %v131_v11 = vld [vmem:[%s502_s3 + $0xf0] sm:$0xff]  ;;  %v129_v13 = vld [vmem:[%s502_s3 + $0xe0] sm:$0xff]  ;;  %v35_v14 = vld [vmem:[%s500_s1 + $0x48] sm:$0xff]  ;;  %159 = vmatpush.msra.mxu3 %v132_v12 }
   0x6   :  { %61 = vmatpush.msra.mxu0 %v39_v2  ;;  %139 = vmatpush.msra.mxu2 %v131_v11  ;;  %v130_v15 = vld [vmem:[%s502_s3 + $0xe8] sm:$0xff]  ;;  %v45_v16 = vld [vmem:[%s500_s1 + $0x98] sm:$0xff]  ;;  %v127_v17 = vld [vmem:[%s502_s3 + $0xd0] sm:$0xff] }
   0x7   :  { %88 = vmatpush.msra.mxu1 %v48_v6  ;;  %v34_v18 = vld [vmem:[%s500_s1 + $0x40] sm:$0xff]  ;;  %v128_v19 = vld [vmem:[%s502_s3 + $0xd8] sm:$0xff]  ;;  %v44_v20 = vld [vmem:[%s500_s1 + $0x90] sm:$0xff]  ;;  %160 = vmatpush.msra.mxu3 %v130_v15 }
   0x8   :  { %62 = vmatpush.msra.mxu0 %v38_v5  ;;  %140 = vmatpush.msra.mxu2 %v129_v13  ;;  %v125_v21 = vld [vmem:[%s502_s3 + $0xc0] sm:$0xff]  ;;  %v33_v22 = vld [vmem:[%s500_s1 + $0x38] sm:$0xff]  ;;  %v126_v23 = vld [vmem:[%s502_s3 + $0xc8] sm:$0xff] }
   0x9   :  { %89 = vmatpush.msra.mxu1 %v47_v8  ;;  %v43_v24 = vld [vmem:[%s500_s1 + $0x88] sm:$0xff]  ;;  %161 = vmatpush.msra.mxu3 %v128_v19  ;;  %v123_v25 = vld [vmem:[%s502_s3 + $0xb0] sm:$0xff]  ;;  %v42_v27 = vld [vmem:[%s500_s1 + $0x80] sm:$0xff] }
   0xa   :  { %63 = vmatpush.msra.mxu0 %v37_v7  ;;  %141 = vmatpush.msra.mxu2 %v127_v17  ;;  %v32_v26 = vld [vmem:[%s500_s1 + $0x30] sm:$0xff]  ;;  %v124_v28 = vld [vmem:[%s502_s3 + $0xb8] sm:$0xff]  ;;  %v121_v29 = vld [vmem:[%s502_s3 + $0xa0] sm:$0xff] }
   0xb   :  { %90 = vmatpush.msra.mxu1 %v46_v10  ;;  %162 = vmatpush.msra.mxu3 %v126_v23 }
   0xc   :  { %64 = vmatpush.msra.mxu0 %v36_v9  ;;  %142 = vmatpush.msra.mxu2 %v125_v21 }
   0xd   :  { %91 = vmatpush.msra.mxu1 %v45_v16 }
   0xe   :  { %65 = vmatpush.msra.mxu0 %v35_v14 }
   0xf   :  { %92 = vmatpush.msra.mxu1 %v44_v20 }
  0x10   :  { %66 = vmatpush.msra.mxu0 %v34_v18 }
  0x12   :  { %67 = vmatpush.msra.mxu0 %v33_v22 }
  0x13   :  { %13 = vsyncpa [#allocation5], 0  ;;  %v31_v30 = vld [vmem:[%s500_s1 + $0x28] sm:$0xff]  ;;  %93 = vmatpush.msra.mxu1 %v43_v24  ;;  %vm55_vm0 = vcmask 588800   ;;  %143 = vmatpush.msra.mxu2 %v123_v25  ;;  %v119_v33 = vld [vmem:[%s502_s3 + $0x90] sm:$0xff]  ;;  %s271_s19 = smov [#allocation2]  }
  0x14   :  { %v25_v31 = vld [vmem:[%s499_s0 + $0x8] sm:$0xff]  ;;  %68 = vmatpush.msra.mxu0 %v32_v26  ;;  %163 = vmatpush.msra.mxu3 %v124_v28  ;;  %v30_v34 = vld [vmem:[%s500_s1 + $0x20] sm:$0xff]  ;;  %v120_v35 = vld [vmem:[%s502_s3 + $0x98] sm:$0xff]  ;;  %s188_s20 = sshll.u32 %s271_s19, 4  ;;  %s201_s26 = sshll.u32 %s505_s6, 4  ;;  %s189_s20 = int_to_ptr.vmem [resolvable:$true] %s188_s20  ;;  %s202_s26 = int_to_ptr.hbm [resolvable:$true] %s201_s26 }
  0x15   :  { %v122_v32 = vld [vmem:[%s502_s3 + $0xa8] sm:$0xff]  ;;  %94 = vmatpush.msra.mxu1 %v42_v27  ;;  %144 = vmatpush.msra.mxu2 %v121_v29  ;;  %v117_v36 = vld [vmem:[%s502_s3 + $0x80] sm:$0xff]  ;;  %v29_v37 = vld [vmem:[%s500_s1 + $0x18] sm:$0xff] }
  0x16   :  { %69 = vmatpush.msra.mxu0 %v31_v30  ;;  %215 = vmatmul.msk.f32.vlgmr.msra.gmra.mxu1 %vm55_vm0, %v25_v31  ;;  %v118_v38 = vld [vmem:[%s502_s3 + $0x88] sm:$0xff]  ;;  %v115_v39 = vld [vmem:[%s502_s3 + $0x70] sm:$0xff]  ;;  %v116_v41 = vld [vmem:[%s502_s3 + $0x78] sm:$0xff] }
  0x17   :  { %164 = vmatpush.msra.mxu3 %v122_v32  ;;  %145 = vmatpush.msra.mxu2 %v119_v33  ;;  %v28_v40 = vld [vmem:[%s500_s1 + $0x10] sm:$0xff]  ;;  %v113_v42 = vld [vmem:[%s502_s3 + $0x60] sm:$0xff]  ;;  %v27_v43 = vld [vmem:[%s500_s1 + $0x8] sm:$0xff] }
  0x18   :  { %70 = vmatpush.msra.mxu0 %v30_v34  ;;  %v114_v44 = vld [vmem:[%s502_s3 + $0x68] sm:$0xff]  ;;  %v111_v45 = vld [vmem:[%s502_s3 + $0x50] sm:$0xff]  ;;  %v26_v46 = vld [vmem:[%s500_s1] sm:$0xff] }
  0x19   :  { %165 = vmatpush.msra.mxu3 %v120_v35  ;;  %146 = vmatpush.msra.mxu2 %v117_v36  ;;  %v24_v47 = vld [vmem:[%s499_s0] sm:$0xff]  ;;  %v112_v48 = vld [vmem:[%s502_s3 + $0x58] sm:$0xff]  ;;  %v110_v50 = vld [vmem:[%s502_s3 + $0x48] sm:$0xff] }
  0x1a   :  { %71 = vmatpush.msra.mxu0 %v29_v37  ;;  %v109_v49 = vld [vmem:[%s502_s3 + $0x40] sm:$0xff]  ;;  %v107_v51 = vld [vmem:[%s502_s3 + $0x30] sm:$0xff]  ;;  %v108_v52 = vld [vmem:[%s502_s3 + $0x38] sm:$0xff] }
  0x1b   :  { %166 = vmatpush.msra.mxu3 %v118_v38  ;;  %147 = vmatpush.msra.mxu2 %v115_v39  ;;  %v105_v53 = vld [vmem:[%s502_s3 + $0x20] sm:$0xff]  ;;  %v106_v54 = vld [vmem:[%s502_s3 + $0x28] sm:$0xff]  ;;  %v103_v55 = vld [vmem:[%s502_s3 + $0x10] sm:$0xff] }
  0x1c   :  { %72 = vmatpush.msra.mxu0 %v28_v40  ;;  %v104_v56 = vld [vmem:[%s502_s3 + $0x18] sm:$0xff]  ;;  %v101_v57 = vld [vmem:[%s502_s3] sm:$0xff]  ;;  %v102_v58 = vld [vmem:[%s502_s3 + $0x8] sm:$0xff]  ;;  %s190_s3 = sshll.u32 %s504_s5, 4  ;;  %s191_s3 = int_to_ptr.hbm [resolvable:$true] %s190_s3 }
  0x1d   :  { %167 = vmatpush.msra.mxu3 %v116_v41  ;;  %148 = vmatpush.msra.mxu2 %v113_v42  ;;  %v218_v59 = vld [vmem:[%s501_s2] ss:$0 sm:$0xff]  ;;  %s272_s2 = smov [#allocation4]  }
  0x1e   :  { %73 = vmatpush.msra.mxu0 %v27_v43  ;;  %v133_v1 = vld [vmem:[%s503_s4] sm:$0x3]  ;;  %s199_s25 = sshll.u32 %s272_s2, 4  ;;  %s200_s25 = int_to_ptr.vmem [resolvable:$true] %s199_s25 }
  0x1f   :  { %168 = vmatpush.msra.mxu3 %v114_v44  ;;  %149 = vmatpush.msra.mxu2 %v111_v45  ;;  %v135_v2 = vperm.slane %v133_v1, 0  ;;  %v136_v3 = vperm.slane %v133_v1, 1 }
  0x20   :  { %74 = vmatpush.msra.mxu0 %v26_v46 }
  0x21   :  { %75 = vmatmul.f32.vlgmr.msra.gmra.mxu0 %v24_v47  ;;  %169 = vmatpush.msra.mxu3 %v112_v48 }
  0x22   :  { %150 = vmatpush.msra.mxu2 %v109_v49 }
  0x23   :  { %170 = vmatpush.msra.mxu3 %v110_v50 }
  0x24   :  { %151 = vmatpush.msra.mxu2 %v107_v51 }
  0x25   :  { %171 = vmatpush.msra.mxu3 %v108_v52 }
  0x26   :  { %152 = vmatpush.msra.mxu2 %v105_v53 }
  0x27   :  { %172 = vmatpush.msra.mxu3 %v106_v54 }
  0x28   :  { %153 = vmatpush.msra.mxu2 %v103_v55 }
  0x29   :  { %173 = vmatpush.msra.mxu3 %v104_v56 }
  0x2a   :  { %154 = vmatpush.msra.mxu2 %v101_v57 }
  0x2b   :  { %174 = vmatpush.msra.mxu3 %v102_v58 }
  0x93   :  { %v96_v61 = vpop.f32.mrf.mxu1 }
  0x9e   :  { %v76_v60 = vpop.f32.mrf.mxu0 }
  0x9f   :  { %v77_v62 = vadd.f32 %v218_v59, %v76_v60 }
  0xa1   :  { %v97_v63 = vadd.f32 %v96_v61, %v77_v62 }
  0xa3   :  { %v99_v0 = vmax.f32 %v97_v63, 0.0 }
  0xa5   :  { %100 = vst [vmem:[#allocation2] sm:$0xff] %v99_v0  ;;  %155 = vmatmul.f32.vlgmr.msra.gmra.mxu2 %v99_v0  ;;  %175 = vmatmul.f32.vlgmr.msra.gmra.mxu3 %v99_v0 }
  0xa6   :  { %193 = dma.vmem_to_hbm [thread:$0]  %s189_s20, 128, %s191_s3, [#allocation3]  }
 0x128   :  { %v156_v4 = vpop.f32.mrf.mxu2  ;;  %v176_v5 = vpop.f32.mrf.mxu3 }
 0x129   :  { %v157_v6 = vadd.f32 %v156_v4, %v135_v2  ;;  %v177_v7 = vadd.f32 %v176_v5, %v136_v3 }
 0x12b   :  { %v179_v8 = vmax.f32 %v157_v6, 0.0  ;;  %v180_v9 = vmax.f32 %v177_v7, 0.0 }
 0x12d   :  { %181 = vst [vmem:[#allocation4] sm:$0xff] %v179_v8 }
 0x12e   :  { %182 = vst.msk [vmem:[#allocation4 + $0x8] sm:$0xff] %vm55_vm0, %v180_v9 }
 0x12f   :  { %204 = dma.vmem_to_hbm [thread:$0]  %s200_s25, 256, %s202_s26, [#allocation5]  }
 0x130   :  { %267 = dma.done.wait [#allocation3], 128  }
 0x131   :  { %268 = vsyncadd [#allocation3], 4294967168 }
 0x132   :  { %269 = dma.done.wait [#allocation5], 256  }
 0x133   :  { %270 = vsyncadd [#allocation5], 4294967040 }
 0x134   :  { %213 = vsyncpa [#allocation3], 1 }
 0x135   :  { %214 = vsyncpa [#allocation5], 1 }

</bundles_post_ra>
